<compile_context>
chip_gen: v6e
topology: v6e:2x2x1
jax: 0.10.0
libtpu: 0.0.40
codegen_flags: <defaults>
</compile_context>

<pallas_src>
import functools

import jax
import jax.numpy as jnp
from jax.experimental import pallas as pl
from jax.experimental.pallas import tpu as pltpu

BLOCK_SIZE = 64  # max context (tril buffer size in the PyTorch module)


def _head_kernel(x_ref, w_ref, o_ref, *, batch, seq_len, n_heads, head_size,
                 compute_dtype):
    # x_ref: (B*T, C)   w_ref: (C, 3*NH) = [K_allheads | Q_allheads | V_allheads]
    # o_ref: (B*T, NH)  with NH = n_heads * head_size
    B, T, H = batch, seq_len, head_size
    NH = n_heads * head_size

    x2d = x_ref[...]                                           # (B*T, C)
    w = w_ref[...]                                             # (C, 3*NH)

    # Fused QKV projection for all heads: one MXU matmul, N = 3*NH.
    qkv = jnp.dot(x2d.astype(compute_dtype), w.astype(compute_dtype),
                  preferred_element_type=jnp.float32)          # (B*T, 3*NH)

    # Lane-aligned segment slices (each segment is NH lanes wide).
    k = qkv[:, 0:NH].reshape(B, T, NH)
    q = qkv[:, NH:2 * NH].reshape(B, T, NH)
    v = qkv[:, 2 * NH:3 * NH].reshape(B, T, NH)

    scale = jnp.float32(H) ** -0.5
    row = jax.lax.broadcasted_iota(jnp.int32, (T, T), 0)
    col = jax.lax.broadcasted_iota(jnp.int32, (T, T), 1)
    causal = row >= col                                        # (T, T)
    neg_big = jnp.float32(-1e30)  # finite: NaN-robust, exp() still underflows to 0

    head_outs = []
    for h in range(n_heads):                                   # unrolled, static
        sl = slice(h * H, (h + 1) * H)
        qh = q[:, :, sl]
        kh = k[:, :, sl]
        vh = v[:, :, sl]

        # Batched q @ k^T: contract last dims directly (no explicit transpose).
        wei = jax.lax.dot_general(
            qh.astype(compute_dtype), kh.astype(compute_dtype),
            dimension_numbers=(((2,), (2,)), ((0,), (0,))),
            preferred_element_type=jnp.float32) * scale        # (B, T, T)

        wei = jnp.where(causal, wei, neg_big)

        # Numerically stable softmax, all in f32, exact division.
        m = jnp.max(wei, axis=-1, keepdims=True)
        p = jnp.exp(wei - m)
        p = p / jnp.sum(p, axis=-1, keepdims=True)

        # Batched p @ v.
        head_outs.append(jax.lax.dot_general(
            p.astype(compute_dtype), vh.astype(compute_dtype),
            dimension_numbers=(((2,), (1,)), ((0,), (0,))),
            preferred_element_type=jnp.float32))               # (B, T, H)

    out = head_outs[0] if n_heads == 1 else jnp.concatenate(head_outs, axis=-1)
    o_ref[...] = out.reshape(B * T, NH).astype(o_ref.dtype)    # lane-dense store


def prepare_head_params(w_keys, w_queries, w_values):
    """Fuse per-head PyTorch-layout (H, C) Linear weights into one (C, 3*NH).

    Ordering is [K_allheads | Q_allheads | V_allheads] so each of the three
    segments sliced inside the kernel starts on a lane-aligned boundary.
    Call once at parameter-load time (NOT per forward call).
    """
    wk = jnp.concatenate([w.T for w in w_keys], axis=1)        # (C, NH)
    wq = jnp.concatenate([w.T for w in w_queries], axis=1)     # (C, NH)
    wv = jnp.concatenate([w.T for w in w_values], axis=1)      # (C, NH)
    return jnp.concatenate([wk, wq, wv], axis=1)               # (C, 3*NH)


def head_forward(x, w_qkv, *, n_heads, head_size, compute_dtype=jnp.float32):
    """x: (B, T, C) float32.  w_qkv: fused (C, 3*n_heads*head_size) weight.

    Returns (B, T, n_heads*head_size).  With n_heads == 1 this is exactly the
    PyTorch `Head.forward` (eval mode).  Set compute_dtype=jnp.bfloat16 on
    v6e/v7x to use the native MXU path (softmax math stays in f32).
    """
    B, T, C = x.shape
    NH = n_heads * head_size
    assert T <= BLOCK_SIZE
    assert w_qkv.shape == (C, 3 * NH)

    # Fold batch onto sublanes in the wrapper (free for a contiguous array),
    # so the kernel never reshapes its input block.
    x2d = x.reshape(B * T, C)

    kernel = functools.partial(
        _head_kernel, batch=B, seq_len=T, n_heads=n_heads,
        head_size=head_size, compute_dtype=compute_dtype)

    # Whole problem is far under VMEM capacity on every generation: no grid,
    # no scalar prefetch — map full arrays into VMEM and run a single body.
    out2d = pl.pallas_call(
        kernel,
        out_shape=jax.ShapeDtypeStruct((B * T, NH), x.dtype),
        in_specs=[
            pl.BlockSpec(memory_space=pltpu.MemorySpace.VMEM),  # x2d
            pl.BlockSpec(memory_space=pltpu.MemorySpace.VMEM),  # fused W
        ],
        out_specs=pl.BlockSpec(memory_space=pltpu.MemorySpace.VMEM),
    )(x2d, w_qkv)

    return out2d.reshape(B, T, NH)


def head_reference(x, w_key, w_query, w_value):
    """Plain-JAX reference matching the PyTorch forward (eval mode), f32."""
    hi = jax.lax.Precision.HIGHEST
    k = jnp.einsum("btc,hc->bth", x, w_key, precision=hi)
    q = jnp.einsum("btc,hc->bth", x, w_query, precision=hi)
    v = jnp.einsum("btc,hc->bth", x, w_value, precision=hi)
    H = k.shape[-1]
    wei = jnp.einsum("bqh,bkh->bqk", q, k, precision=hi) * (H ** -0.5)
    T = x.shape[1]
    tril = jnp.tril(jnp.ones((T, T), dtype=bool))
    wei = jnp.where(tril, wei, -jnp.inf)
    wei = jax.nn.softmax(wei, axis=-1)
    return jnp.einsum("bqk,bkh->bqh", wei, v, precision=hi)


if __name__ == "__main__":
    # Small shapes consistent with the module: batch=2, seq=8 (<= BLOCK_SIZE),
    # n_embd=32, head_size=16, dropout=0.0 (eval mode).
    B, T, C, H = 2, 8, 32, 16

    key = jax.random.PRNGKey(0)
    kx, kk, kq, kv = jax.random.split(key, 4)
    x = jax.random.normal(kx, (B, T, C), dtype=jnp.float32)

    # ---- single head: exactly the original PyTorch `Head` module -----------
    w_key = jax.random.normal(kk, (H, C), dtype=jnp.float32) * (C ** -0.5)
    w_query = jax.random.normal(kq, (H, C), dtype=jnp.float32) * (C ** -0.5)
    w_value = jax.random.normal(kv, (H, C), dtype=jnp.float32) * (C ** -0.5)

    w_qkv_1 = prepare_head_params([w_key], [w_query], [w_value])
    out1 = jax.block_until_ready(head_forward(x, w_qkv_1, n_heads=1, head_size=H))
    ref1 = head_reference(x, w_key, w_query, w_value)
    assert out1.shape == (B, T, H)
    assert jnp.allclose(out1, ref1, atol=1e-4, rtol=1e-4), "single-head mismatch"

    # ---- 8 fused heads: lane-dense output (last dim = 128), one kernel -----
    N_HEADS = 8
    hkeys = jax.random.split(jax.random.PRNGKey(1), 3 * N_HEADS)
    w_keys = [jax.random.normal(hkeys[3 * h + 0], (H, C), jnp.float32) * (C ** -0.5)
              for h in range(N_HEADS)]
    w_queries = [jax.random.normal(hkeys[3 * h + 1], (H, C), jnp.float32) * (C ** -0.5)
                 for h in range(N_HEADS)]
    w_values = [jax.random.normal(hkeys[3 * h + 2], (H, C), jnp.float32) * (C ** -0.5)
                for h in range(N_HEADS)]

    w_qkv_8 = prepare_head_params(w_keys, w_queries, w_values)
    out8 = jax.block_until_ready(
        head_forward(x, w_qkv_8, n_heads=N_HEADS, head_size=H))
    ref8 = jnp.concatenate(
        [head_reference(x, w_keys[h], w_queries[h], w_values[h])
         for h in range(N_HEADS)], axis=-1)
    assert out8.shape == (B, T, N_HEADS * H)
    assert jnp.allclose(out8, ref8, atol=1e-4, rtol=1e-4), "multi-head mismatch"

    print("KERNEL_OK")
</pallas_src>

<mosaic_0001>
module attributes {stable_mosaic.version = 11 : i64} {
  func.func @_head_kernel(%arg0: memref<16x32xf32, #tpu.memory_space<vmem>>, %arg1: memref<32x48xf32, #tpu.memory_space<vmem>>, %arg2: memref<16x16xf32, #tpu.memory_space<vmem>>) attributes {dimension_semantics = [], scalar_prefetch = 0 : i64, scratch_operands = 0 : i64, tpu.core_type = #tpu.core_type<tc>} {
    %c0 = arith.constant 0 : index
    %c0_0 = arith.constant 0 : index
    %0 = vector.load %arg0[%c0, %c0_0] : memref<16x32xf32, #tpu.memory_space<vmem>>, vector<16x32xf32>
    %c0_1 = arith.constant 0 : index
    %c0_2 = arith.constant 0 : index
    %1 = vector.load %arg1[%c0_1, %c0_2] : memref<32x48xf32, #tpu.memory_space<vmem>>, vector<32x48xf32>
    %cst = arith.constant dense<0.000000e+00> : vector<16x48xf32>
    %2 = tpu.matmul %0, %1, %cst {dimension_numbers = #tpu.dot_dimension_numbers<[1], [0], [0], [1], [0, 0, 1, 1], [], []>} : vector<16x32xf32>, vector<32x48xf32>, vector<16x48xf32> -> vector<16x48xf32>
    %3 = vector.extract_strided_slice %2 {offsets = [0, 0], sizes = [16, 16], strides = [1, 1]} : vector<16x48xf32> to vector<16x16xf32>
    %4 = vector.shape_cast %3 : vector<16x16xf32> to vector<2x8x16xf32>
    %5 = vector.extract_strided_slice %2 {offsets = [0, 16], sizes = [16, 16], strides = [1, 1]} : vector<16x48xf32> to vector<16x16xf32>
    %6 = vector.shape_cast %5 : vector<16x16xf32> to vector<2x8x16xf32>
    %7 = vector.extract_strided_slice %2 {offsets = [0, 32], sizes = [16, 16], strides = [1, 1]} : vector<16x48xf32> to vector<16x16xf32>
    %8 = vector.shape_cast %7 : vector<16x16xf32> to vector<2x8x16xf32>
    %cst_3 = arith.constant 1.600000e+01 : f32
    %cst_4 = arith.constant -5.000000e-01 : f32
    %9 = math.powf %cst_3, %cst_4 : f32
    %10 = tpu.iota {dimensions = array<i32: 0>} : vector<8x8xi32>
    %11 = tpu.iota {dimensions = array<i32: 1>} : vector<8x8xi32>
    %12 = arith.cmpi sge, %10, %11 : vector<8x8xi32>
    %cst_5 = arith.constant dense<0.000000e+00> : vector<2x8x8xf32>
    %13 = tpu.matmul %6, %4, %cst_5 {dimension_numbers = #tpu.dot_dimension_numbers<[2], [2], [1], [1], [0, 0, 0, 1, 1, 1], [0], [0]>} : vector<2x8x16xf32>, vector<2x8x16xf32>, vector<2x8x8xf32> -> vector<2x8x8xf32>
    %14 = vector.broadcast %9 : f32 to vector<2x8x8xf32>
    %15 = arith.mulf %13, %14 : vector<2x8x8xf32>
    %cst_6 = arith.constant -1.000000e+30 : f32
    %16 = vector.shape_cast %12 : vector<8x8xi1> to vector<1x8x8xi1>
    %17 = vector.broadcast %16 : vector<1x8x8xi1> to vector<2x8x8xi1>
    %18 = vector.broadcast %cst_6 : f32 to vector<2x8x8xf32>
    %19 = arith.select %17, %15, %18 : vector<2x8x8xi1>, vector<2x8x8xf32>
    %cst_7 = arith.constant dense<0xFF800000> : vector<2x8xf32>
    %20 = vector.multi_reduction <maximumf>, %19, %cst_7 [2] : vector<2x8x8xf32> to vector<2x8xf32>
    %21 = vector.shape_cast %20 : vector<2x8xf32> to vector<2x8x1xf32>
    %22 = vector.broadcast %21 : vector<2x8x1xf32> to vector<2x8x8xf32>
    %23 = arith.subf %19, %22 : vector<2x8x8xf32>
    %24 = math.exp %23 : vector<2x8x8xf32>
    %cst_8 = arith.constant dense<0.000000e+00> : vector<2x8xf32>
    %25 = vector.multi_reduction <add>, %24, %cst_8 [2] : vector<2x8x8xf32> to vector<2x8xf32>
    %26 = vector.shape_cast %25 : vector<2x8xf32> to vector<2x8x1xf32>
    %27 = vector.broadcast %26 : vector<2x8x1xf32> to vector<2x8x8xf32>
    %28 = arith.divf %24, %27 : vector<2x8x8xf32>
    %cst_9 = arith.constant dense<0.000000e+00> : vector<2x8x16xf32>
    %29 = tpu.matmul %28, %8, %cst_9 {dimension_numbers = #tpu.dot_dimension_numbers<[2], [1], [1], [2], [0, 0, 0, 1, 1, 2], [0], [0]>} : vector<2x8x8xf32>, vector<2x8x16xf32>, vector<2x8x16xf32> -> vector<2x8x16xf32>
    %30 = vector.shape_cast %29 : vector<2x8x16xf32> to vector<16x16xf32>
    %c0_10 = arith.constant 0 : index
    %c0_11 = arith.constant 0 : index
    %31 = vector.load %arg2[%c0_10, %c0_11] : memref<16x16xf32, #tpu.memory_space<vmem>>, vector<16x16xf32>
    tpu.vector_store %arg2[%c0_10, %c0_11], %30 {strides = array<i32>} : memref<16x16xf32, #tpu.memory_space<vmem>>, vector<16x16xf32>,
    return
  }
}

</mosaic_0001>

<bundles_post_ra>
// kernel: tpu_custom_call.1
= control target key start
LH: loop header
LB: loop body
LE: loop exit
PB: predicated region body
PF: predicated region fallthrough
CT: control target
= control target key end

     0   :  { %7 = vsyncpa [#allocation3], 0  ;;  %s685_s0 = inlined_call_operand.hbm [shape: f32[16,32], index: 0, kind: input, shape index: {}]   ;;  %s686_s1 = inlined_call_operand.hbm [shape: f32[32,48], index: 1, kind: input, shape index: {}]   ;;  %s687_s2 = inlined_call_operand.hbm [shape: f32[16,16], index: 2, kind: output, shape index: {}]  }
   0x1   :  { %8 = vsyncpa [#allocation6], 0 }
   0x2   :  { %9 = vsyncpa [#allocation4], 0  ;;  %s625_s9 = smov [#allocation2]  }
   0x3   :  { %s15_s10 = sshll.u32 %s625_s9, 4  ;;  %s16_s10 = int_to_ptr.vmem [resolvable:$true] %s15_s10 }
   0x4   :  { %s567_s11 = scalar_lea.vmem %s16_s10, 256  ;;  %p572_p1 = scmp.lt.s32.totalorder %s16_s10, %s16_s10 }
   0x5   :  { %p568_p0 = scmp.ne.s32.totalorder %s16_s10, %s567_s11  ;;  %p573_p2 = scmp.lt.s32.totalorder %s567_s11, %s567_s11 }
   0x7   :  { %p574_p3 = por %p573_p2, %p572_p1 }
   0x9   :  { %p575_p4 = pnand %p574_p3, %p568_p0 }
   0xb   :  { %578 = shalt.err (!%p575_p4)
}
   0xc   :  { %s626_s12 = smov 128   ;;  %s627_s13 = smov 8  }
   0xd   :  { %21 = dma.hbm_to_vmem [thread:$0]  %s685_s0, 256, %s16_s10, [#allocation3], %s626_s12, %s626_s12, %s627_s13  }
   0xe   :  { %s628_s16 = smov [#allocation5]  }
   0xf   :  { %s27_s17 = sshll.u32 %s628_s16, 4  ;;  %s28_s17 = int_to_ptr.vmem [resolvable:$true] %s27_s17 }
  0x10   :  { %s587_s18 = scalar_lea.vmem %s28_s17, 512  ;;  %p592_p6 = scmp.lt.s32.totalorder %s28_s17, %s28_s17 }
  0x11   :  { %p588_p5 = scmp.ne.s32.totalorder %s28_s17, %s587_s18  ;;  %p593_p7 = scmp.lt.s32.totalorder %s587_s18, %s587_s18 }
  0x13   :  { %p594_p8 = por %p593_p7, %p592_p6 }
  0x15   :  { %p595_p9 = pnand %p594_p8, %p588_p5 }
  0x17   :  { %598 = shalt.err (!%p595_p9)
}
  0x18   :  { %33 = dma.hbm_to_vmem [thread:$0]  %s686_s1, 512, %s28_s17, [#allocation6], %s626_s12, %s626_s12, %s627_s13  }
  0x19   :  { %619 = dma.done.wait [#allocation3], 256  }
  0x1a   :  { %620 = vsyncadd [#allocation3], 4294967040 }
  0x1b   :  { %621 = dma.done.wait [#allocation6], 512  }
  0x1c   :  { %622 = vsyncadd [#allocation6], 4294966784  ;;  %vm46_vm0 = vcmask 261120   ;;  %v45_v0 = vld [vmem:[#allocation5 + $0x18] sm:$0xff]  ;;  %v44_v1 = vld [vmem:[#allocation5 + $0x10] sm:$0xff]  ;;  %v629_v6 = vmov 0.0   ;;  %v128_v11 = vlaneseq }
  0x1d   :  { %511 = vmatprep.subr.mxu0 %v45_v0  ;;  %v40_v2 = vld [vmem:[#allocation2] sm:$0xff]  ;;  %v43_v3 = vld [vmem:[#allocation5 + $0x8] sm:$0xff]  ;;  %v42_v4 = vld [vmem:[#allocation5] sm:$0xff]  ;;  %522 = vmatprep.subr.mxu1 %v629_v6  ;;  %vm630_vm1 = vmmov 0   ;;  %vm136_vm2 = vcmask 130048   ;;  %s631_s0 = smov 112  }
  0x1e   :  { %512 = vmatpush3.msra.mxu0 %v45_v0  ;;  %519 = vmatprep.mubr.msk.f32.mxu0 %vm46_vm0, %v40_v2  ;;  %v41_v5 = vld [vmem:[#allocation2 + $0x8] sm:$0xff]  ;;  %v129_v12 = vshrl.u32 %v128_v11, 7  ;;  %v131_v13 = vand.u32 127, %v128_v11  ;;  %vm294_vm4 = vcmask 64512   ;;  %s632_s1 = smov 96   ;;  %s633_s21 = smov [#allocation7]  }
  0x1f   :  { %513 = vmatprep.subr.mxu0 %v44_v1  ;;  %524 = vmatprep.mubr.msk.f32.mxu1 %vm630_vm1, %v629_v6  ;;  %s476_s22 = sshll.u32 %s633_s21, 4  ;;  %s477_s22 = int_to_ptr.vmem [resolvable:$true] %s476_s22 }
  0x20   :  { %514 = vmatpush3.msra.mxu0 %v44_v1  ;;  %vm132_vm3 = vcmp.ge.s32.totalorder %v129_v12, %v131_v13  ;;  %s599_s23 = scalar_lea.vmem %s477_s22, 256  ;;  %p604_p11 = scmp.lt.s32.totalorder %s477_s22, %s477_s22 }
  0x21   :  { %515 = vmatprep.subr.mxu0 %v43_v3  ;;  %p600_p10 = scmp.ne.s32.totalorder %s477_s22, %s599_s23  ;;  %p605_p12 = scmp.lt.s32.totalorder %s599_s23, %s599_s23 }
  0x22   :  { %516 = vmatpush3.msra.mxu0 %v43_v3 }
  0x23   :  { %517 = vmatprep.subr.mxu0 %v42_v4  ;;  %p606_p13 = por %p605_p12, %p604_p11 }
  0x24   :  { %518 = vmatpush3.msra.mxu0 %v42_v4 }
  0x25   :  { %520 = vmatmul.mubr.msk.f32.vlgmr.msra.gmra.mxu0 %vm46_vm0, %v41_v5  ;;  %532 = vmatprep.subr.mxu0 %v629_v6  ;;  %p607_p0 = pnand %p606_p13, %p600_p10 }
  0x26   :  { %534 = vmatprep.mubr.msk.f32.mxu0 %vm630_vm1, %v629_v6 }
  0xe5   :  { %v521_v7 = vpop.f32.mrf.mxu0 }
  0xe7   :  { %v119_v8 = vpop.f32.mrf.mxu0 }
  0xe8   :  { %134 = vrot.lane.b32.xlu0 %v119_v8, %s631_s0  ;;  %523 = vmatpush3.xpose.msk.msra.mxu1 %vm136_vm2, %v119_v8 }
  0xe9   :  { %527 = vmatprep.subr.mxu1 %v629_v6 }
  0xec   :  { %212 = vrot.lane.b32.xlu0 %v521_v7, %s631_s0 }
 0x15a   :  { %v135_v9 = vpop.permute.xlu0 %134 }
 0x15b   :  { %525 = vmatmul.mubr.msk.f32.vlgmr.msra.gmra.mxu1 %vm136_vm2, %v135_v9 }
 0x15c   :  { %528 = vmatpush3.xpose.msk.msra.mxu1 %vm136_vm2, %v521_v7  ;;  %529 = vmatprep.mubr.msk.f32.mxu1 %vm630_vm1, %v629_v6 }
 0x15d   :  { %537 = vmatprep.subr.mxu1 %v629_v6 }
 0x15e   :  { %v213_v10 = vpop.permute.xlu0 %212 }
 0x15f   :  { %530 = vmatmul.mubr.msk.f32.vlgmr.msra.gmra.mxu1 %vm136_vm2, %v213_v10 }
 0x160   :  { %539 = vmatprep.mubr.msk.f32.mxu1 %vm630_vm1, %v629_v6 }
 0x21b   :  { %v207_v14 = vpop.f32.mrf.mxu1 }
 0x21c   :  { %v288_v15 = vmul.f32 0.25, %v207_v14 }
 0x21d   :  { %v526_v16 = vpop.f32.mrf.mxu1 }
 0x21e   :  { %v292_v17 = vsel %vm132_vm3, %v288_v15, -1e+30 }
 0x21f   :  { %v284_v18 = vpop.f32.mrf.mxu1  ;;  %v295_v19 = vsel %vm294_vm4, %v292_v17, -inf }
 0x220   :  { %v289_v20 = vmul.f32 0.25, %v284_v18  ;;  %296 = vmax.xlane.f32.xlu1 %v295_v19 }
 0x221   :  { %v531_v21 = vpop.f32.mrf.mxu1 }
 0x222   :  { %v293_v22 = vsel %vm132_vm3, %v289_v20, -1e+30 }
 0x223   :  { %v298_v23 = vsel %vm294_vm4, %v293_v22, -inf }
 0x224   :  { %299 = vmax.xlane.f32.xlu1 %v298_v23 }
 0x235   :  { %317 = vrot.lane.b32.xlu1 %v119_v8, %s632_s1 }
 0x2a9   :  { %v297_v24 = vpop.xlane.xlu1 %296 }
 0x2aa   :  { %v301_v25 = vsub.f32 %v292_v17, %v297_v24 }
 0x2ac   :  { %v303_v26 = vmul.f32 1.442695, %v301_v25 }
 0x2ad   :  { %v300_v27 = vpop.xlane.xlu1 %299 }
 0x2ae   :  { %551 = vpow2.f32 %v303_v26  ;;  %v302_v28 = vsub.f32 %v293_v22, %v300_v27 }
 0x2b0   :  { %v305_v29 = vmul.f32 1.442695, %v302_v28 }
 0x2b1   :  { %v318_v30 = vpop.permute.xlu1 %317 }
 0x2b2   :  { %553 = vpow2.f32 %v305_v29  ;;  %533 = vmatpush3.msra.mxu0 %v318_v30 }
 0x2bb   :  { %v552_v31 = vpop.eup %551 }
 0x2bc   :  { %v307_v32 = vsel %vm294_vm4, %v552_v31, 0.0 }
 0x2bd   :  { %308 = vadd.xlane.f32.xlu0 %v307_v32 }
 0x2bf   :  { %v554_v33 = vpop.eup %553 }
 0x2c0   :  { %v310_v34 = vsel %vm294_vm4, %v554_v33, 0.0 }
 0x2c1   :  { %311 = vadd.xlane.f32.xlu1 %v310_v34 }
 0x2d2   :  { %393 = vrot.lane.b32.xlu1 %v521_v7, %s632_s1 }
 0x346   :  { %v309_v35 = vpop.xlane.xlu0 %308 }
 0x347   :  { %555 = vrcp.f32 %v309_v35 }
 0x34a   :  { %v312_v36 = vpop.xlane.xlu1 %311 }
 0x34b   :  { %557 = vrcp.f32 %v312_v36 }
 0x34e   :  { %v394_v37 = vpop.permute.xlu1 %393 }
 0x34f   :  { %538 = vmatpush3.msra.mxu1 %v394_v37 }
 0x354   :  { %v556_v38 = vpop.eup %555 }
 0x355   :  { %v314_v39 = vmul.f32 %v556_v38, %v552_v31 }
 0x357   :  { %535 = vmatmul.mubr.msk.f32.vlgmr.msra.gmra.mxu0 %vm294_vm4, %v314_v39 }
 0x358   :  { %v558_v40 = vpop.eup %557 }
 0x359   :  { %v316_v41 = vmul.f32 %v558_v40, %v554_v33 }
 0x35b   :  { %540 = vmatmul.mubr.msk.f32.vlgmr.msra.gmra.mxu1 %vm294_vm4, %v316_v41 }
 0x417   :  { %v389_v42 = vpop.f32.mrf.mxu0 }
 0x418   :  { %469 = vst.msk [vmem:[#allocation7] sm:$0xff] %vm136_vm2, %v389_v42 }
 0x419   :  { %v536_v43 = vpop.f32.mrf.mxu0 }
 0x41b   :  { %v465_v44 = vpop.f32.mrf.mxu1 }
 0x41c   :  { %470 = vst.msk [vmem:[#allocation7 + $0x8] sm:$0xff] %vm136_vm2, %v465_v44 }
 0x41d   :  { %v541_v45 = vpop.f32.mrf.mxu1 }
 0x41e   :  { %610 = shalt.err (!%p607_p0)
}
 0x41f   :  { %482 = dma.vmem_to_hbm [thread:$0]  %s477_s22, 256, %s687_s2, [#allocation4], %s626_s12, %s626_s12, %s627_s13  }
 0x420   :  { %623 = dma.done.wait [#allocation4], 256  }
 0x421   :  { %624 = vsyncadd [#allocation4], 4294967040 }
 0x422   :  { %486 = vsyncpa [#allocation3], 1 }
 0x423   :  { %487 = vsyncpa [#allocation6], 1 }
 0x424   :  { %488 = vsyncpa [#allocation4], 1 }

</bundles_post_ra>
